<compile_context>
chip_gen: v7x
topology: tpu7x:2x2x1
jax: 0.10.0
libtpu: 0.0.40
codegen_flags: <defaults>
</compile_context>

<pallas_src>
import functools

import jax
import jax.numpy as jnp
from jax.experimental import pallas as pl
from jax.experimental.pallas import tpu as pltpu


def _normalize_kernel(scale_ref, bias_ref, x_ref, o_ref, *, tile_r):
    # scale_ref / bias_ref: full (N*C, 1) f32, VMEM-resident across the grid.
    # x_ref / o_ref:        (tile_r, tile_l) blocks.
    r0 = pl.multiple_of(pl.program_id(0) * tile_r, tile_r)
    scale = scale_ref[pl.ds(r0, tile_r), :]
    bias = bias_ref[pl.ds(r0, tile_r), :]
    x = x_ref[...].astype(jnp.float32)  # keep f32 math (v5e has no bf16 VALU)
    o_ref[...] = (x * scale + bias).astype(o_ref.dtype)


def _aligned_divisor(n, align, cap):
    """Largest d <= cap with d % align == 0 and n % d == 0, else None."""
    best = None
    d = align
    cap = min(n, cap)
    while d <= cap:
        if n % d == 0:
            best = d
        d += align
    return best


def _tpu_generation():
    try:
        kind = jax.devices()[0].device_kind.lower()
    except Exception:
        return None
    for g in range(9, 1, -1):
        if f"v{g}" in kind:
            return g
    return None


def _choose_tiles(rows, lanes, elem_bytes, *, target_block_bytes, row_align,
                  want_two_blocks):
    max_elems = max(row_align * 128, target_block_bytes // elem_bytes)

    # Lane tile: multiple of 128 dividing H*W, capped so that at least
    # `row_align` rows always fit inside the block budget.
    lane_cap = max(128, max_elems // row_align)
    tile_l = _aligned_divisor(lanes, 128, lane_cap)
    if tile_l is None:
        tile_l = lanes  # no 128-aligned divisor -> full-dim exception

    # Row tile: dtype-aware sublane alignment, falling back to plain 8.
    remaining = max(1, max_elems // tile_l)
    tile_r = _aligned_divisor(rows, row_align, remaining)
    if tile_r is None and row_align != 8:
        tile_r = _aligned_divisor(rows, 8, remaining)
    if tile_r is None:
        # Full-dim row fallback (e.g. N*C = 6): re-shrink the lane tile so the
        # block never exceeds the budget even for large spatial sizes.
        tile_r = rows
        if tile_r * tile_l > max_elems:
            shrunk = _aligned_divisor(lanes, 128, max(128, max_elems // tile_r))
            if shrunk is not None:
                tile_l = shrunk

    # v7x: guarantee >= 2 parallel grid blocks so both TensorCores get work.
    if want_two_blocks and (rows // tile_r) * (lanes // tile_l) < 2:
        half = _aligned_divisor(lanes, 128, max(128, tile_l // 2))
        if half is not None and lanes // half >= 2:
            tile_l = half

    return tile_r, tile_l


def normalize(x, mean, std):
    """x: (N, C, H, W); mean, std: (C,). Returns (x - mean_c) / std_c."""
    N, C, H, W = x.shape
    rows, lanes = N * C, H * W

    mean = jnp.asarray(mean, dtype=jnp.float32)
    std = jnp.asarray(std, dtype=jnp.float32)

    # Hoisted per-channel constants, one scalar per (n, c) row.
    scale = 1.0 / std                                   # (C,)
    bias = -mean * scale                                # (C,)
    scale_rows = jnp.tile(scale, N).reshape(rows, 1)    # (N*C, 1) f32
    bias_rows = jnp.tile(bias, N).reshape(rows, 1)      # (N*C, 1) f32

    x2 = x.reshape(rows, lanes)  # free for contiguous NCHW

    elem_bytes = jnp.dtype(x.dtype).itemsize
    row_align = {4: 8, 2: 16, 1: 32}.get(elem_bytes, 8)

    gen = _tpu_generation()
    if gen is not None and gen >= 7:
        # Faster HBM -> amortize per-step overhead with bigger blocks; only
        # 64 MiB physical VMEM, so set an explicit (safe) scoped limit.
        target_block_bytes = 6 * 1024 * 1024
        vmem_limit_bytes = 48 * 1024 * 1024
        want_two_blocks = True  # 2 TensorCores per chip
    elif gen == 6:
        target_block_bytes = 4 * 1024 * 1024  # 4x double-buffered << 32 MiB
        vmem_limit_bytes = None
        want_two_blocks = False
    else:
        # v5e (16 MiB scoped default) and unknown devices: keep 2 MiB blocks.
        target_block_bytes = 2 * 1024 * 1024
        vmem_limit_bytes = None
        want_two_blocks = False

    tile_r, tile_l = _choose_tiles(
        rows, lanes, elem_bytes,
        target_block_bytes=target_block_bytes,
        row_align=row_align,
        want_two_blocks=want_two_blocks)
    grid = (rows // tile_r, lanes // tile_l)

    cp_kwargs = dict(dimension_semantics=("parallel", "parallel"))
    if vmem_limit_bytes is not None:
        cp_kwargs["vmem_limit_bytes"] = vmem_limit_bytes

    out2 = pl.pallas_call(
        functools.partial(_normalize_kernel, tile_r=tile_r),
        out_shape=jax.ShapeDtypeStruct((rows, lanes), x.dtype),
        grid=grid,
        in_specs=[
            # scale/bias: whole array resident across the grid (constant map).
            pl.BlockSpec((rows, 1), lambda i, j: (0, 0)),
            pl.BlockSpec((rows, 1), lambda i, j: (0, 0)),
            pl.BlockSpec((tile_r, tile_l), lambda i, j: (i, j)),
        ],
        out_specs=pl.BlockSpec((tile_r, tile_l), lambda i, j: (i, j)),
        compiler_params=pltpu.CompilerParams(**cp_kwargs),
    )(scale_rows, bias_rows, x2)

    return out2.reshape(N, C, H, W)


if __name__ == "__main__":
    # ImageNet-style constants, as the module's __init__ would receive them.
    mean = jnp.array([0.485, 0.456, 0.406], dtype=jnp.float32)
    std = jnp.array([0.229, 0.224, 0.225], dtype=jnp.float32)

    key = jax.random.PRNGKey(0)
    x = jax.random.uniform(key, (2, 3, 16, 16), dtype=jnp.float32)

    out = normalize(x, mean, std)
    out = jax.block_until_ready(out)

    # Reference (matches PyTorch broadcast semantics).
    ref = (x - mean.reshape(1, 3, 1, 1)) / std.reshape(1, 3, 1, 1)
    assert out.shape == x.shape and out.dtype == x.dtype
    assert jnp.allclose(out, ref, atol=1e-5, rtol=1e-5)

    print("KERNEL_OK")
</pallas_src>

<mosaic_0001>
module attributes {stable_mosaic.version = 11 : i64} {
  func.func @_normalize_kernel(%arg0: i32, %arg1: i32, %arg2: memref<6x1xf32, #tpu.memory_space<vmem>>, %arg3: memref<6x1xf32, #tpu.memory_space<vmem>>, %arg4: memref<6x256xf32, #tpu.memory_space<vmem>>, %arg5: memref<6x256xf32, #tpu.memory_space<vmem>>) attributes {dimension_semantics = [#tpu.dimension_semantics<parallel>, #tpu.dimension_semantics<parallel>], iteration_bounds = array<i64: 1, 1>, scalar_prefetch = 0 : i64, scratch_operands = 0 : i64, tpu.core_type = #tpu.core_type<tc>, window_params = [{pipeline_mode = #tpu.pipeline_mode<synchronous>, transform_indices = @transform_0, window_bounds = array<i64: 6, 1>}, {pipeline_mode = #tpu.pipeline_mode<synchronous>, transform_indices = @transform_1, window_bounds = array<i64: 6, 1>}, {transform_indices = @transform_2, window_bounds = array<i64: 6, 256>}, {transform_indices = @transform_3, window_bounds = array<i64: 6, 256>}]} {
    %c6_i32 = arith.constant 6 : i32
    %0 = arith.muli %arg0, %c6_i32 : i32
    %1 = tpu.assume_multiple %0, 6 : i32
    %2 = arith.index_cast %1 : i32 to index
    %c0 = arith.constant 0 : index
    %3 = vector.load %arg2[%2, %c0] : memref<6x1xf32, #tpu.memory_space<vmem>>, vector<6x1xf32>
    %4 = arith.index_cast %1 : i32 to index
    %c0_0 = arith.constant 0 : index
    %5 = vector.load %arg3[%4, %c0_0] : memref<6x1xf32, #tpu.memory_space<vmem>>, vector<6x1xf32>
    %c0_1 = arith.constant 0 : index
    %c0_2 = arith.constant 0 : index
    %6 = vector.load %arg4[%c0_1, %c0_2] : memref<6x256xf32, #tpu.memory_space<vmem>>, vector<6x256xf32>
    %7 = vector.broadcast %3 : vector<6x1xf32> to vector<6x256xf32>
    %8 = arith.mulf %6, %7 : vector<6x256xf32>
    %9 = vector.broadcast %5 : vector<6x1xf32> to vector<6x256xf32>
    %10 = arith.addf %8, %9 : vector<6x256xf32>
    %c0_3 = arith.constant 0 : index
    %c0_4 = arith.constant 0 : index
    %11 = vector.load %arg5[%c0_3, %c0_4] : memref<6x256xf32, #tpu.memory_space<vmem>>, vector<6x256xf32>
    tpu.vector_store %arg5[%c0_3, %c0_4], %10 {strides = array<i32>} : memref<6x256xf32, #tpu.memory_space<vmem>>, vector<6x256xf32>,
    return
  }
  func.func @transform_0(%arg0: i32, %arg1: i32) -> (i32, i32) {
    %c0_i32 = arith.constant 0 : i32
    %c0_i32_0 = arith.constant 0 : i32
    %c0_i32_1 = arith.constant 0 : i32
    return %c0_i32, %c0_i32_0 : i32, i32
  }
  func.func @transform_1(%arg0: i32, %arg1: i32) -> (i32, i32) {
    %c0_i32 = arith.constant 0 : i32
    %c0_i32_0 = arith.constant 0 : i32
    %c0_i32_1 = arith.constant 0 : i32
    return %c0_i32, %c0_i32_0 : i32, i32
  }
  func.func @transform_2(%arg0: i32, %arg1: i32) -> (i32, i32) {
    %c0_i32 = arith.constant 0 : i32
    return %arg0, %arg1 : i32, i32
  }
  func.func @transform_3(%arg0: i32, %arg1: i32) -> (i32, i32) {
    %c0_i32 = arith.constant 0 : i32
    return %arg0, %arg1 : i32, i32
  }
}

</mosaic_0001>

<bundles_post_ra>
// kernel: tpu_custom_call.1
= control target key start
LH: loop header
LB: loop body
LE: loop exit
PB: predicated region body
PF: predicated region fallthrough
CT: control target
= control target key end

     0   :  { %v79_v1 = vmov 0   ;;  %s125_s0 = inlined_call_operand.vmem [shape: f32[6,1], index: 0, kind: input, shape index: {}]   ;;  %s126_s1 = inlined_call_operand.vmem [shape: f32[6,1], index: 1, kind: input, shape index: {}]   ;;  %s127_s2 = inlined_call_operand.vmem [shape: f32[6,256], index: 2, kind: input, shape index: {}]   ;;  %s128_s3 = inlined_call_operand.hbm [shape: f32[6,256], index: 3, kind: output, shape index: {}]  }
   0x1   :  { %v17_v0 = vld [vmem:[%s125_s0] sm:$0x3f]  ;;  %54 = vset.pattern.permute.xlu0 %v79_v1 }
   0x2   :  { %8 = vsyncpa [#allocation3], 0  ;;  %24 = vperm.xlu0 %54, %v17_v0   ;;  %v19_v2 = vld [vmem:[%s126_s1] sm:$0x3f]  ;;  %v21_v4 = vld [vmem:[%s127_s2 + $0x8] sm:$0x3f] }
   0x3   :  { %v20_v3 = vld [vmem:[%s127_s2] sm:$0x3f]  ;;  %s80_s20 = smov [#allocation2]  }
   0x4   :  { %s44_s0 = sshll.u32 %s80_s20, 4  ;;  %s45_s0 = int_to_ptr.vmem [resolvable:$true] %s44_s0 }
   0x5   :  { %s55_s1 = scalar_lea.vmem %s45_s0, 256  ;;  %p60_p1 = scmp.lt.s32.totalorder %s45_s0, %s45_s0 }
   0x6   :  { %31 = vperm.xlu0 %54, %v19_v2   ;;  %p56_p0 = scmp.ne.s32.totalorder %s45_s0, %s55_s1  ;;  %p61_p2 = scmp.lt.s32.totalorder %s55_s1, %s55_s1 }
   0x8   :  { %p62_p3 = por %p61_p2, %p60_p1 }
   0xa   :  { %p63_p4 = pnand %p62_p3, %p56_p0 }
  0x81   :  { %v25_v5 = vpop.permute.xlu0 %24 }
  0x82   :  { %v27_v6 = vmul.f32 %v25_v5, %v20_v3  ;;  %v28_v7 = vmul.f32 %v25_v5, %v21_v4 }
  0x85   :  { %v32_v8 = vpop.permute.xlu0 %31 }
  0x86   :  { %v34_v9 = vadd.f32 %v32_v8, %v27_v6  ;;  %v35_v10 = vadd.f32 %v32_v8, %v28_v7 }
  0x88   :  { %36 = vst [vmem:[#allocation2] sm:$0x3f] %v34_v9  ;;  %37 = vst [vmem:[#allocation2 + $0x8] sm:$0x3f] %v35_v10 }
  0x89   :  { %66 = shalt.err (!%p63_p4)
}
  0x8a   :  { %s67_s22 = scalar_lea.hbm %s128_s3, 256 }
  0x8b   :  { %p68_p5 = scmp.ne.s32.totalorder %s128_s3, %s67_s22  ;;  %p71_p6 = scmp.lt.u32.totalorder %s67_s22, %s128_s3 }
  0x8d   :  { %p73_p7 = pnand %p71_p6, %p68_p5 }
  0x8f   :  { %76 = shalt.err (!%p73_p7)
}
  0x90   :  { %47 = dma.vmem_to_hbm [thread:$0]  %s45_s0, 256, %s128_s3, [#allocation3]  }
  0x91   :  { %77 = dma.done.wait [#allocation3], 256  }
  0x92   :  { %78 = vsyncadd [#allocation3], 4294967040 }
  0x93   :  { %51 = vsyncpa [#allocation3], 1 }

</bundles_post_ra>
